<compile_context>
chip_gen: v7x
topology: tpu7x:2x2x1
jax: 0.10.0
libtpu: 0.0.40
codegen_flags: <defaults>
</compile_context>

<pallas_src>
import functools
import math

import jax
import jax.numpy as jnp
import numpy as np
from jax.experimental import pallas as pl
from jax.experimental.pallas import tpu as pltpu


def _round_up(x: int, m: int) -> int:
    return ((x + m - 1) // m) * m


# ----------------------------------------------------------------------------
# Host-side (numpy) constant tables -- match torchaudio semantics exactly
# ----------------------------------------------------------------------------
def _hann_window_periodic_np(win_length: int) -> np.ndarray:
    n = np.arange(win_length, dtype=np.float64)
    return (0.5 * (1.0 - np.cos(2.0 * np.pi * n / win_length))).astype(np.float32)


def _hz_to_mel_slaney(freq: float) -> float:
    f_sp = 200.0 / 3.0
    min_log_hz = 1000.0
    min_log_mel = min_log_hz / f_sp
    logstep = math.log(6.4) / 27.0
    if freq >= min_log_hz:
        return min_log_mel + math.log(freq / min_log_hz) / logstep
    return freq / f_sp


def _mel_to_hz_slaney_np(mels: np.ndarray) -> np.ndarray:
    f_sp = 200.0 / 3.0
    min_log_hz = 1000.0
    min_log_mel = min_log_hz / f_sp
    logstep = math.log(6.4) / 27.0
    return np.where(
        mels >= min_log_mel,
        min_log_hz * np.exp(logstep * (mels - min_log_mel)),
        f_sp * mels,
    )


def _melscale_fbanks_slaney_np(
    n_freqs: int, f_min: float, f_max: float, n_mels: int, sample_rate: float
) -> np.ndarray:
    """Slaney mel scale + slaney norm. Returns (n_freqs, n_mels) float32."""
    all_freqs = np.linspace(0.0, sample_rate // 2, n_freqs)
    m_min = _hz_to_mel_slaney(f_min)
    m_max = _hz_to_mel_slaney(f_max)
    m_pts = np.linspace(m_min, m_max, n_mels + 2)
    f_pts = _mel_to_hz_slaney_np(m_pts)                      # (n_mels+2,)

    f_diff = f_pts[1:] - f_pts[:-1]                          # (n_mels+1,)
    slopes = f_pts[None, :] - all_freqs[:, None]             # (n_freqs, n_mels+2)
    down_slopes = -slopes[:, :-2] / f_diff[:-1]              # (n_freqs, n_mels)
    up_slopes = slopes[:, 2:] / f_diff[1:]                   # (n_freqs, n_mels)
    fb = np.maximum(0.0, np.minimum(down_slopes, up_slopes))
    enorm = 2.0 / (f_pts[2: n_mels + 2] - f_pts[:n_mels])    # slaney norm
    return (fb * enorm[None, :]).astype(np.float32)


def _dft_matrices_np(n_fft: int):
    """Real-DFT matrices (n_fft, n_freqs): cos(ang), -sin(ang)."""
    n_freqs = n_fft // 2 + 1
    n = np.arange(n_fft, dtype=np.float64)[:, None]
    k = np.arange(n_freqs, dtype=np.float64)[None, :]
    ang = 2.0 * np.pi * n * k / n_fft
    return np.cos(ang).astype(np.float32), (-np.sin(ang)).astype(np.float32)


@functools.lru_cache(maxsize=None)
def _kernel_tables(n_fft, win_length, f_min, f_max, sample_rate, n_mels,
                   n_freqs_pad, n_mels_pad, dtype):
    """Window-folded lane-padded DFT matrix (n_fft, 2*n_freqs_pad) and
    lane-padded slaney mel filterbank (n_freqs_pad, n_mels_pad), both cast to
    the requested matmul dtype."""
    n_freqs = n_fft // 2 + 1

    # torch.stft centers the win_length window inside the n_fft frame
    win = _hann_window_periodic_np(win_length)
    window = np.zeros(n_fft, np.float32)
    left = (n_fft - win_length) // 2
    window[left: left + win_length] = win

    cos_m, sin_m = _dft_matrices_np(n_fft)                   # (n_fft, n_freqs)
    dft = np.zeros((n_fft, 2 * n_freqs_pad), np.float32)
    dft[:, :n_freqs] = cos_m
    dft[:, n_freqs_pad: n_freqs_pad + n_freqs] = sin_m
    dft *= window[:, None]                                   # fold Hann window

    fb = _melscale_fbanks_slaney_np(n_freqs, f_min, f_max, n_mels, sample_rate)
    fb_pad = np.zeros((n_freqs_pad, n_mels_pad), np.float32)
    fb_pad[:n_freqs, :n_mels] = fb
    return jnp.asarray(dft, dtype=dtype), jnp.asarray(fb_pad, dtype=dtype)


# ----------------------------------------------------------------------------
# Pallas kernel: fused windowed-DFT + power + sqrt + mel + log/clamp per tile
# ----------------------------------------------------------------------------
def _mel_pallas(frames, dft, fb, *, tile_rows, num_tiles, n_freqs_pad):
    batch, _, n_fft = frames.shape
    n_cols = dft.shape[1]                 # 2 * n_freqs_pad
    n_mels_pad = fb.shape[1]
    T = tile_rows
    mm_dtype = dft.dtype                  # bf16 (fast) or f32 (validation)

    def kernel(x_ref, dft_ref, fb_ref, out_ref):
        # Single K = n_fft MXU matmul; accumulation stays in the MXU pipeline.
        acc = jnp.dot(x_ref[0], dft_ref[...],
                      preferred_element_type=jnp.float32)    # (T, 2*n_freqs_pad) f32
        re = acc[:, :n_freqs_pad]                            # lane-aligned slices
        im = acc[:, n_freqs_pad:]
        spectr = jnp.sqrt(re * re + im * im + 1e-9)          # f32 VPU/EUP
        mel = jnp.dot(spectr.astype(mm_dtype), fb_ref[...],
                      preferred_element_type=jnp.float32)    # (T, n_mels_pad)
        out_ref[0] = jnp.log(jnp.maximum(mel, 1e-5))         # lane-dense store

    return pl.pallas_call(
        kernel,
        out_shape=jax.ShapeDtypeStruct((batch, num_tiles * T, n_mels_pad),
                                       jnp.float32),
        grid_spec=pltpu.PrefetchScalarGridSpec(
            num_scalar_prefetch=0,
            grid=(batch, num_tiles),
            in_specs=[
                # frame tile (already assembled in the wrapper, no halo needed)
                pl.BlockSpec((1, T, n_fft), lambda b, i: (b, i, 0)),
                # window-folded DFT matrix (grid-invariant)
                pl.BlockSpec((n_fft, n_cols), lambda b, i: (0, 0)),
                # slaney mel filterbank (grid-invariant)
                pl.BlockSpec((n_freqs_pad, n_mels_pad), lambda b, i: (0, 0)),
            ],
            out_specs=pl.BlockSpec((1, T, n_mels_pad), lambda b, i: (b, i, 0)),
        ),
        compiler_params=pltpu.CompilerParams(
            dimension_semantics=("parallel", "parallel"),
            # ~10 MiB live in bf16 for the real HiFiGAN config; explicit limit
            # is load-bearing on v5e (16 MiB scoped default) and safe on v7x.
            vmem_limit_bytes=32 * 1024 * 1024,
        ),
    )(frames, dft, fb)


# ----------------------------------------------------------------------------
# Full forward pass wrapper
# ----------------------------------------------------------------------------
def hifigan_mel_spectrogram(
    waveform,
    *,
    hop_size: int,
    n_fft: int,
    win_length: int,
    f_min,
    f_max,
    sample_rate,
    n_mels: int,
    tile_rows: int = 256,
    matmul_dtype=jnp.bfloat16,
):
    """waveform: (batch, time) float32 -> (batch, n_mels, n_frames) float32."""
    waveform = waveform.astype(jnp.float32)
    batch, _ = waveform.shape
    if f_min is None:
        f_min = 0.0
    if f_max is None:
        f_max = float(sample_rate) / 2.0
    dt = np.dtype(matmul_dtype)

    pad_size = int((n_fft - hop_size) / 2)

    # 1. reflect padding (== F.pad(..., mode='reflect'))
    padded = jnp.pad(waveform, ((0, 0), (pad_size, pad_size)), mode="reflect")
    padded_len = padded.shape[1]
    n_frames = (padded_len - n_fft) // hop_size + 1          # center=False STFT
    assert n_frames >= 1, "waveform too short for one STFT frame"

    n_freqs = n_fft // 2 + 1
    n_freqs_pad = _round_up(n_freqs, 128)
    n_mels_pad = _round_up(n_mels, 128)

    # --- frame-tile sizing -------------------------------------------------
    # Keep the MXU M-dim well fed (cap 256) but avoid pushing hundreds of dead
    # rows through the pipeline on short clips; nudge the total parallel work
    # (batch * num_tiles) even so v7x's 2 TensorCores both stay busy.
    t_cap = max(16, _round_up(tile_rows, 16))
    num_tiles = -(-n_frames // t_cap)
    if (batch * num_tiles) % 2 == 1 and n_frames >= 32:
        num_tiles += 1
    T = _round_up(-(-n_frames // num_tiles), 16)
    rows_pad = num_tiles * T

    # 2. frame materialization (batch, rows_pad, n_fft)
    if n_fft % hop_size == 0:
        # q shifted slices of a hop-chunk view + one concat -- no gather
        q = n_fft // hop_size
        c_total = max(rows_pad + q - 1, -(-padded_len // hop_size))
        total_len = c_total * hop_size
        padded2 = jnp.pad(padded, ((0, 0), (0, total_len - padded_len)))
        chunks = padded2.reshape(batch, c_total, hop_size)
        frames = jnp.concatenate(
            [chunks[:, j: j + rows_pad, :] for j in range(q)], axis=-1)
    else:
        # general hop: gather fallback
        idx = (jnp.arange(n_frames)[:, None] * hop_size
               + jnp.arange(n_fft)[None, :])
        frames = padded[:, idx]                              # (batch, n_frames, n_fft)
        frames = jnp.pad(frames, ((0, 0), (0, rows_pad - n_frames), (0, 0)))

    frames = frames.astype(dt)                               # bf16 MXU feed

    dft, fb = _kernel_tables(n_fft, win_length, float(f_min), float(f_max),
                             float(sample_rate), n_mels, n_freqs_pad,
                             n_mels_pad, dt)

    # 3. hot path in Pallas
    out = _mel_pallas(frames, dft, fb, tile_rows=T, num_tiles=num_tiles,
                      n_freqs_pad=n_freqs_pad)

    # 4. strip lane/row padding, back to PyTorch layout (batch, n_mels, n_frames)
    return out[:, :n_frames, :n_mels].transpose(0, 2, 1)


# ----------------------------------------------------------------------------
# Pure-JAX reference (high precision) for correctness checking
# ----------------------------------------------------------------------------
def _reference_mel(waveform, *, hop_size, n_fft, win_length, f_min, f_max,
                   sample_rate, n_mels):
    waveform = waveform.astype(jnp.float32)
    pad_size = int((n_fft - hop_size) / 2)
    padded = jnp.pad(waveform, ((0, 0), (pad_size, pad_size)), mode="reflect")
    n_frames = (padded.shape[1] - n_fft) // hop_size + 1
    idx = jnp.arange(n_frames)[:, None] * hop_size + jnp.arange(n_fft)[None, :]
    frames = padded[:, idx]                                  # (B, F, n_fft)

    win = _hann_window_periodic_np(win_length)
    window = np.zeros(n_fft, np.float32)
    left = (n_fft - win_length) // 2
    window[left: left + win_length] = win
    cos_m, sin_m = _dft_matrices_np(n_fft)

    xw = frames * jnp.asarray(window)[None, None, :]
    hi = jax.lax.Precision.HIGHEST
    re = jnp.einsum("bfn,nk->bfk", xw, jnp.asarray(cos_m), precision=hi)
    im = jnp.einsum("bfn,nk->bfk", xw, jnp.asarray(sin_m), precision=hi)
    spectr = jnp.sqrt(re * re + im * im + 1e-9)
    fb = jnp.asarray(_melscale_fbanks_slaney_np(
        n_fft // 2 + 1, float(f_min), float(f_max), n_mels, float(sample_rate)))
    mel = jnp.einsum("bfk,km->bfm", spectr, fb, precision=hi)
    mel = jnp.log(jnp.maximum(mel, 1e-5))
    return mel.transpose(0, 2, 1)


if __name__ == "__main__":
    key = jax.random.PRNGKey(0)

    # small, self-consistent config (real HiFiGAN: n_fft=1024, hop=256, n_mels=80)
    batch = 2
    time_len = 256
    cfg = dict(hop_size=16, n_fft=64, win_length=64, f_min=0.0, f_max=4000.0,
               sample_rate=8000, n_mels=16)

    waveform = jax.random.normal(key, (batch, time_len), dtype=jnp.float32)
    ref = _reference_mel(waveform, **cfg)

    pad_size = int((cfg["n_fft"] - cfg["hop_size"]) / 2)
    expected_frames = (time_len + 2 * pad_size - cfg["n_fft"]) // cfg["hop_size"] + 1

    # --- f32 matmul path: tight check against the high-precision reference ---
    fn32 = jax.jit(functools.partial(hifigan_mel_spectrogram,
                                     matmul_dtype=jnp.float32, **cfg))
    out32 = jax.block_until_ready(fn32(waveform))
    assert out32.shape == (batch, cfg["n_mels"], expected_frames), out32.shape
    assert bool(jnp.all(jnp.isfinite(out32)))
    err32 = float(jnp.max(jnp.abs(out32 - ref)))
    assert err32 < 5e-2, f"f32 path max log-mel error vs reference: {err32}"

    # --- bf16 matmul path (default / fast): looser max, tight mean ---
    fn16 = jax.jit(functools.partial(hifigan_mel_spectrogram, **cfg))
    out16 = jax.block_until_ready(fn16(waveform))
    assert out16.shape == (batch, cfg["n_mels"], expected_frames), out16.shape
    assert bool(jnp.all(jnp.isfinite(out16)))
    err16_max = float(jnp.max(jnp.abs(out16 - ref)))
    err16_mean = float(jnp.mean(jnp.abs(out16 - ref)))
    assert err16_max < 1.5e-1, f"bf16 path max log-mel error: {err16_max}"
    assert err16_mean < 3e-2, f"bf16 path mean log-mel error: {err16_mean}"

    print("KERNEL_OK")
</pallas_src>

<mosaic_0001>
module attributes {stable_mosaic.version = 11 : i64} {
  func.func @kernel(%arg0: i32, %arg1: i32, %arg2: memref<1x16x64xf32, #tpu.memory_space<vmem>>, %arg3: memref<64x256xf32, #tpu.memory_space<vmem>>, %arg4: memref<128x128xf32, #tpu.memory_space<vmem>>, %arg5: memref<1x16x128xf32, #tpu.memory_space<vmem>>) attributes {dimension_semantics = [#tpu.dimension_semantics<parallel>, #tpu.dimension_semantics<parallel>], iteration_bounds = array<i64: 2, 1>, scalar_prefetch = 0 : i64, scratch_operands = 0 : i64, tpu.core_type = #tpu.core_type<tc>, window_params = [{transform_indices = @transform_0, window_bounds = array<i64: 1, 16, 64>}, {pipeline_mode = #tpu.pipeline_mode<synchronous>, transform_indices = @transform_1, window_bounds = array<i64: 64, 256>}, {pipeline_mode = #tpu.pipeline_mode<synchronous>, transform_indices = @transform_2, window_bounds = array<i64: 128, 128>}, {transform_indices = @transform_3, window_bounds = array<i64: 1, 16, 128>}]} {
    %c0 = arith.constant 0 : index
    %c0_0 = arith.constant 0 : index
    %c0_1 = arith.constant 0 : index
    %0 = vector.load %arg2[%c0, %c0_0, %c0_1] : memref<1x16x64xf32, #tpu.memory_space<vmem>>, vector<1x16x64xf32>
    %1 = vector.shape_cast %0 : vector<1x16x64xf32> to vector<16x64xf32>
    %c0_2 = arith.constant 0 : index
    %c0_3 = arith.constant 0 : index
    %2 = vector.load %arg3[%c0_2, %c0_3] : memref<64x256xf32, #tpu.memory_space<vmem>>, vector<64x256xf32>
    %cst = arith.constant dense<0.000000e+00> : vector<16x256xf32>
    %3 = tpu.matmul %1, %2, %cst {dimension_numbers = #tpu.dot_dimension_numbers<[1], [0], [0], [1], [0, 0, 1, 1], [], []>} : vector<16x64xf32>, vector<64x256xf32>, vector<16x256xf32> -> vector<16x256xf32>
    %4 = vector.extract_strided_slice %3 {offsets = [0, 0], sizes = [16, 128], strides = [1, 1]} : vector<16x256xf32> to vector<16x128xf32>
    %5 = vector.extract_strided_slice %3 {offsets = [0, 128], sizes = [16, 128], strides = [1, 1]} : vector<16x256xf32> to vector<16x128xf32>
    %6 = arith.mulf %4, %4 : vector<16x128xf32>
    %7 = arith.mulf %5, %5 : vector<16x128xf32>
    %8 = arith.addf %6, %7 : vector<16x128xf32>
    %cst_4 = arith.constant 9.99999971E-10 : f32
    %9 = vector.broadcast %cst_4 : f32 to vector<16x128xf32>
    %10 = arith.addf %8, %9 : vector<16x128xf32>
    %11 = math.sqrt %10 : vector<16x128xf32>
    %c0_5 = arith.constant 0 : index
    %c0_6 = arith.constant 0 : index
    %12 = vector.load %arg4[%c0_5, %c0_6] : memref<128x128xf32, #tpu.memory_space<vmem>>, vector<128x128xf32>
    %cst_7 = arith.constant dense<0.000000e+00> : vector<16x128xf32>
    %13 = tpu.matmul %11, %12, %cst_7 {dimension_numbers = #tpu.dot_dimension_numbers<[1], [0], [0], [1], [0, 0, 1, 1], [], []>} : vector<16x128xf32>, vector<128x128xf32>, vector<16x128xf32> -> vector<16x128xf32>
    %cst_8 = arith.constant 9.99999974E-6 : f32
    %14 = vector.broadcast %cst_8 : f32 to vector<16x128xf32>
    %15 = arith.maximumf %13, %14 : vector<16x128xf32>
    %16 = math.log %15 : vector<16x128xf32>
    %c0_9 = arith.constant 0 : index
    %c0_10 = arith.constant 0 : index
    %c0_11 = arith.constant 0 : index
    %17 = vector.load %arg5[%c0_9, %c0_10, %c0_11] : memref<1x16x128xf32, #tpu.memory_space<vmem>>, vector<1x16x128xf32>
    %18 = vector.shape_cast %17 : vector<1x16x128xf32> to vector<16x128xf32>
    %19 = vector.shape_cast %16 : vector<16x128xf32> to vector<1x16x128xf32>
    tpu.vector_store %arg5[%c0_9, %c0_10, %c0_11], %19 {strides = array<i32>} : memref<1x16x128xf32, #tpu.memory_space<vmem>>, vector<1x16x128xf32>,
    return
  }
  func.func @transform_0(%arg0: i32, %arg1: i32) -> (i32, i32, i32) {
    %c0_i32 = arith.constant 0 : i32
    %c0_i32_0 = arith.constant 0 : i32
    return %arg0, %arg1, %c0_i32 : i32, i32, i32
  }
  func.func @transform_1(%arg0: i32, %arg1: i32) -> (i32, i32) {
    %c0_i32 = arith.constant 0 : i32
    %c0_i32_0 = arith.constant 0 : i32
    %c0_i32_1 = arith.constant 0 : i32
    return %c0_i32, %c0_i32_0 : i32, i32
  }
  func.func @transform_2(%arg0: i32, %arg1: i32) -> (i32, i32) {
    %c0_i32 = arith.constant 0 : i32
    %c0_i32_0 = arith.constant 0 : i32
    %c0_i32_1 = arith.constant 0 : i32
    return %c0_i32, %c0_i32_0 : i32, i32
  }
  func.func @transform_3(%arg0: i32, %arg1: i32) -> (i32, i32, i32) {
    %c0_i32 = arith.constant 0 : i32
    %c0_i32_0 = arith.constant 0 : i32
    return %arg0, %arg1, %c0_i32 : i32, i32, i32
  }
}

</mosaic_0001>

<bundles_post_ra>
// kernel: hifigan_mel_spectrogram.1
= control target key start
LH: loop header
LB: loop body
LE: loop exit
PB: predicated region body
PF: predicated region fallthrough
CT: control target
= control target key end

     0   :  { %s714_s12 = smov 0   ;;  %s716_s13 = smov 0   ;;  %s854_s0 = inlined_call_operand.vmem [shape: f32[2,16,64], index: 0, kind: input, shape index: {}]   ;;  %s855_s1 = inlined_call_operand.vmem [shape: f32[64,256], index: 1, kind: input, shape index: {}]   ;;  %s856_s2 = inlined_call_operand.vmem [shape: f32[128,128], index: 2, kind: input, shape index: {}]   ;;  %s857_s3 = inlined_call_operand.vmem [shape: f32[2,16,128], index: 3, kind: output, shape index: {}]  }
   0x1   :  { %s718_s14 = smov 0  }
   0x2 LB: > { %s25_s15 = sadd.s32 1, %s687_s13  ;;  %p524_p0 = scmp.ge.s32.totalorder %s691_s14, 1  ;;  %s691_s14 = sphi %s718_s14, %s13_s14   ;;  %s687_s13 = sphi %s716_s13, %s859_s13   ;;  %s683_s12 = sphi %s714_s12, %s858_s12  }
   0x3   : > { %p27_p1 = scmp.ge.s32.totalorder %s25_s15, 2  ;;  %p158_p2 = scmp.lt.s32.totalorder %s691_s14, 3 }
   0x5   : > { %s861_s15 = smov (%p27_p1, %s25_s15), 0  ;;  %p159_p3 = pnand %p524_p0, %p158_p2 }
   0x6   : > { %v213_v0 = vld [vmem:[%s855_s1 + $0x8] sm:$0xff] (!%p159_p3)  ;;  %v215_v1 = vld [vmem:[%s855_s1 + $0x18] sm:$0xff] (!%p159_p3)  ;;  %v212_v2 = vld [vmem:[%s855_s1] sm:$0xff] (!%p159_p3)  ;;  %v693_v7 = vmov (!%p159_p3), 0.0   ;;  %p191_p4 = scmp.lt.s32.totalorder (!%p159_p3), %s683_s12, 1  ;;  %vm228_vm0 = vcmask (!%p159_p3), 523264  }
   0x7   : > { %162 = sbr.rel (%p159_p3) target bundleno = 492 (0x1ec), region = 32  ;;  %v588_v3 = vpack.c.bf16 (!%p159_p3), %v215_v1, %v213_v0  ;;  %v214_v4 = vld [vmem:[%s855_s1 + $0x10] sm:$0xff] (!%p159_p3)  ;;  %v217_v5 = vld [vmem:[%s855_s1 + $0x28] sm:$0xff] (!%p159_p3)  ;;  %v219_v6 = vld [vmem:[%s855_s1 + $0x38] sm:$0xff] (!%p159_p3)  ;;  %299 = vmatprep.mubr.f32.mxu0 (!%p159_p3), %v693_v7 }
   0x8   : > { %v590_v8 = vpack.c.bf16 (!%p159_p3), %v214_v4, %v212_v2  ;;  %v592_v9 = vpack.c.bf16 (!%p159_p3), %v219_v6, %v217_v5  ;;  %v216_v10 = vld [vmem:[%s855_s1 + $0x20] sm:$0xff] (!%p159_p3)  ;;  %v218_v11 = vld [vmem:[%s855_s1 + $0x30] sm:$0xff] (!%p159_p3)  ;;  %v221_v12 = vld [vmem:[%s855_s1 + $0x48] sm:$0xff] (!%p159_p3) }
   0x9   : > { %589 = vmatprep.subr.bf16.mxu0 (!%p159_p3), %v588_v3  ;;  %v223_v13 = vld [vmem:[%s855_s1 + $0x58] sm:$0xff] (!%p159_p3)  ;;  %v594_v14 = vpack.c.bf16 (!%p159_p3), %v218_v11, %v216_v10  ;;  %v220_v15 = vld [vmem:[%s855_s1 + $0x40] sm:$0xff] (!%p159_p3)  ;;  %v222_v17 = vld [vmem:[%s855_s1 + $0x50] sm:$0xff] (!%p159_p3) }
   0xa   : > { %591 = vmatpush1.bf16.msra.mxu0 (!%p159_p3), %v590_v8  ;;  %v596_v16 = vpack.c.bf16 (!%p159_p3), %v223_v13, %v221_v12  ;;  %v334_v18 = vld [vmem:[%s856_s2] sm:$0xff] (!%p159_p3)  ;;  %v335_v19 = vld [vmem:[%s856_s2 + $0x8] sm:$0xff] (!%p159_p3)  ;;  %v227_v21 = vld [vmem:[%s855_s1 + $0x78] sm:$0xff] (!%p159_p3)  ;;  %v598_v25 = vpack.c.bf16 (!%p159_p3), %v222_v17, %v220_v15 }
   0xb   : > { %593 = vmatprep.subr.bf16.mxu0 (!%p159_p3), %v592_v9  ;;  %v225_v20 = vld [vmem:[%s855_s1 + $0x68] sm:$0xff] (!%p159_p3)  ;;  %v604_v22 = vpack.c.bf16 (!%p159_p3), %v335_v19, %v334_v18  ;;  %v336_v23 = vld [vmem:[%s856_s2 + $0x10] sm:$0xff] (!%p159_p3)  ;;  %v337_v24 = vld [vmem:[%s856_s2 + $0x18] sm:$0xff] (!%p159_p3) }
   0xc   : > { %v608_v26 = vpack.c.bf16 (!%p159_p3), %v337_v24, %v336_v23  ;;  %v600_v27 = vpack.c.bf16 (!%p159_p3), %v227_v21, %v225_v20  ;;  %v224_v28 = vld [vmem:[%s855_s1 + $0x60] sm:$0xff] (!%p159_p3)  ;;  %v226_v29 = vld [vmem:[%s855_s1 + $0x70] sm:$0xff] (!%p159_p3)  ;;  %v339_v34 = vld [vmem:[%s856_s2 + $0x28] sm:$0xff] (!%p159_p3) }
   0xd   : > { %605 = vmatprep.subr.bf16.mxu1 (!%p159_p3), %v604_v22  ;;  %v602_v30 = vpack.c.bf16 (!%p159_p3), %v226_v29, %v224_v28  ;;  %v338_v33 = vld [vmem:[%s856_s2 + $0x20] sm:$0xff] (!%p159_p3)  ;;  %v340_v36 = vld [vmem:[%s856_s2 + $0x30] sm:$0xff] (!%p159_p3)  ;;  %v341_v37 = vld [vmem:[%s856_s2 + $0x38] sm:$0xff] (!%p159_p3) }
   0xe   : > { %s863_s12 = smov (!%p191_p4, %s683_s12), 1  ;;  %595 = vmatpush1.bf16.msra.mxu0 %v594_v14  ;;  %607 = vmatpush3.bf16.msra.mxu1 %v604_v22  ;;  %v612_v35 = vpack.c.bf16 %v339_v34, %v338_v33  ;;  %v616_v38 = vpack.c.bf16 %v341_v37, %v340_v36  ;;  %v342_v39 = vld [vmem:[%s856_s2 + $0x40] sm:$0xff]  ;;  %v343_v40 = vld [vmem:[%s856_s2 + $0x48] sm:$0xff]  ;;  %v344_v42 = vld [vmem:[%s856_s2 + $0x50] sm:$0xff] }
   0xf   : > { %597 = vmatprep.subr.bf16.mxu0 %v596_v16  ;;  %s533_s6 = sshll.u32 %s863_s12, 4  ;;  %609 = vmatprep.subr.bf16.mxu1 %v608_v26  ;;  %v620_v41 = vpack.c.bf16 %v343_v40, %v342_v39  ;;  %v345_v43 = vld [vmem:[%s856_s2 + $0x58] sm:$0xff]  ;;  %v346_v44 = vld [vmem:[%s856_s2 + $0x60] sm:$0xff]  ;;  %v347_v46 = vld [vmem:[%s856_s2 + $0x68] sm:$0xff] }
  0x10   : > { %s198_s9 = scalar_lea.vmem %s854_s0, %s533_s6  ;;  %v624_v45 = vpack.c.bf16 %v345_v43, %v344_v42  ;;  %v628_v47 = vpack.c.bf16 %v347_v46, %v346_v44  ;;  %v348_v48 = vld [vmem:[%s856_s2 + $0x70] sm:$0xff]  ;;  %v349_v49 = vld [vmem:[%s856_s2 + $0x78] sm:$0xff]  ;;  %s208_s18 = scalar_lea.vmem %s857_s3, %s533_s6 }
  0x11   : > { %v210_v31 = vld [vmem:[%s198_s9] sm:$0xff]  ;;  %v211_v32 = vld [vmem:[%s198_s9 + $0x8] sm:$0xff]  ;;  %v632_v50 = vpack.c.bf16 %v349_v49, %v348_v48 }
  0x12   : > { %599 = vmatpush1.bf16.msra.mxu0 %v598_v25  ;;  %611 = vmatpush3.bf16.msra.mxu1 %v608_v26 }
  0x13   : > { %601 = vmatprep.subr.bf16.mxu0 %v600_v27  ;;  %613 = vmatprep.subr.bf16.mxu1 %v612_v35 }
  0x16   : > { %603 = vmatpush1.bf16.msra.mxu0 %v602_v30  ;;  %615 = vmatpush3.bf16.msra.mxu1 %v612_v35 }
  0x17   : > { %617 = vmatprep.subr.bf16.mxu1 %v616_v38 }
  0x19   : > { %529 = vmatmul.mubr.msk.f32.vlgmr.msra.gmra.mrb[0].mxu0 %vm228_vm0, %v210_v31 }
  0x1a   : > { %305 = vmatprep.mubr.f32.mxu0 %v693_v7  ;;  %619 = vmatpush3.bf16.msra.mxu1 %v616_v38 }
  0x1b   : > { %621 = vmatprep.subr.bf16.mxu1 %v620_v41 }
  0x1d   : > { %530 = vmatmul.mubr.msk.f32.gmra.mrb[2].mxu0 %vm228_vm0, %v211_v32 }
  0x1e   : > { %623 = vmatpush3.bf16.msra.mxu1 %v620_v41 }
  0x1f   : > { %625 = vmatprep.subr.bf16.mxu1 %v624_v45 }
  0x22   : > { %627 = vmatpush3.bf16.msra.mxu1 %v624_v45 }
  0x23   : > { %629 = vmatprep.subr.bf16.mxu1 %v628_v47 }
  0x26   : > { %631 = vmatpush3.bf16.msra.mxu1 %v628_v47 }
  0x27   : > { %633 = vmatprep.subr.bf16.mxu1 %v632_v50 }
  0x2a   : > { %635 = vmatpush3.bf16.msra.mxu1 %v632_v50 }
  0xec   : > { %v301_v51 = vpop.f32.mrb[0].mxu0 }
  0xed   : > { %v312_v52 = vmul.f32 %v301_v51, %v301_v51  ;;  %v303_v53 = vpop.f32.mrb[1].mxu0 }
  0xee   : > { %v314_v54 = vmul.f32 %v303_v53, %v303_v53 }
  0xf0   : > { %v316_v55 = vadd.f32 %v314_v54, %v312_v52  ;;  %v307_v56 = vpop.f32.mrb[2].mxu0 }
  0xf1   : > { %v313_v57 = vmul.f32 %v307_v56, %v307_v56  ;;  %v309_v58 = vpop.f32.mrb[3].mxu0 }
  0xf2   : > { %v318_v59 = vadd.f32 1e-09, %v316_v55  ;;  %v315_v60 = vmul.f32 %v309_v58, %v309_v58 }
  0xf4   : > { %v317_v61 = vadd.f32 %v315_v60, %v313_v57  ;;  %661 = vrsqrt.f32 %v318_v59  ;;  %vm322_vm1 = vcmp.eq.f32.partialorder %v318_v59, inf  ;;  %v325_v1 = vand.u32 2147483648, %v318_v59 }
  0xf5   : > { %vm324_vm2 = vcmp.eq.f32.partialorder %v318_v59, 0.0 }
  0xf6   : > { %v319_v62 = vadd.f32 1e-09, %v317_v61 }
  0xf8   : > { %663 = vrsqrt.f32 %v319_v62  ;;  %vm329_vm3 = vcmp.eq.f32.partialorder %v319_v62, inf  ;;  %v332_v6 = vand.u32 2147483648, %v319_v62  ;;  %vm331_vm4 = vcmp.eq.f32.partialorder %v319_v62, 0.0 }
  0xfe   : > { %v662_v63 = vpop.eup %661 }
  0xff   : > { %v321_v0 = vmul.f32 %v662_v63, %v318_v59 }
 0x101   : > { %v323_v2 = vsel %vm322_vm1, %v318_v59, %v321_v0 }
 0x102   : > { %v664_v3 = vpop.eup %663  ;;  %v326_v4 = vsel %vm324_vm2, %v325_v1, %v323_v2 }
 0x103   : > { %585 = vmatprep.mubr.f32.mxu1 %v326_v4  ;;  %v328_v5 = vmul.f32 %v664_v3, %v319_v62 }
 0x105   : > { %v330_v7 = vsel %vm329_vm3, %v319_v62, %v328_v5 }
 0x106   : > { %v333_v8 = vsel %vm331_vm4, %v332_v6, %v330_v7 }
 0x107   : > { %586 = vmatmul.mubr.f32.vlgmr.msra.gmra.mrb[0].mxu1 %v333_v8 }
 0x1da   : > { %v587_v9 = vpop.f32.mrb[0].mxu1 }
 0x1db   : > { %v426_v10 = vmax.f32 %v587_v9, 1e-05  ;;  %v416_v11 = vpop.f32.mrb[1].mxu1 }
 0x1dc   : > { %v425_v12 = vmax.f32 %v416_v11, 1e-05 }
 0x1dd   : > { %665 = vlog2.f32 %v426_v10 }
 0x1de   : > { %667 = vlog2.f32 %v425_v12 }
 0x1e7   : > { %v666_v13 = vpop.eup %665 }
 0x1e8   : > { %v668_v14 = vpop.eup %667  ;;  %v430_v15 = vmul.f32 0.6931472, %v666_v13 }
 0x1e9   : > { %v428_v16 = vmul.f32 0.6931472, %v668_v14 }
 0x1ea   : > { %432 = vst [vmem:[%s208_s18 + $0x8] sm:$0xff] %v430_v15 }
 0x1eb   : > { %431 = vst [vmem:[%s208_s18] sm:$0xff] %v428_v16 }
 0x1ec PF: > { %s13_s14 = sadd.s32 1, %s691_s14   ;;  %s858_s12 = smov %s687_s13 }
 0x1ed   : > { %p10_p5 = scmp.ge.s32.totalorder %s13_s14, 4   ;;  %s859_s13 = smov %s861_s15 }
 0x1ef   :  { %12 = sbr.rel (!%p10_p5) target bundleno = 2 (0x2), region = 62 }

</bundles_post_ra>
